<compile_context>
chip_gen: v7x
topology: tpu7x:2x2x1
jax: 0.10.0
libtpu: 0.0.40
codegen_flags: <defaults>
</compile_context>

<pallas_src>
import math
from typing import NamedTuple, Optional

import jax
import jax.numpy as jnp
from jax.experimental import pallas as pl
from jax.experimental.pallas import tpu as pltpu


def _round_up(x: int, m: int) -> int:
    return ((x + m - 1) // m) * m


# ----------------------------------------------------------------- kernels

def _matmul_bias_kernel(x_ref, w_ref, b_ref, o_ref):
    """Grid (i, j), single K block: one MXU dot (bf16 operands, f32 result),
    bias add, direct store.  No accumulator VMEM round-trip."""
    o_ref[...] = (
        jnp.dot(x_ref[...], w_ref[...], preferred_element_type=jnp.float32)
        + b_ref[...]
    ).astype(o_ref.dtype)


def _matmul_bias_acc_kernel(x_ref, w_ref, b_ref, o_ref, acc_ref):
    """Grid (i, j, k) with K reduction: f32 VMEM accumulator, zeroed at k==0,
    bias-add + store on the last k step."""
    k = pl.program_id(2)

    @pl.when(k == 0)
    def _():
        acc_ref[...] = jnp.zeros_like(acc_ref)

    acc_ref[...] += jnp.dot(x_ref[...], w_ref[...],
                            preferred_element_type=jnp.float32)

    @pl.when(k == pl.num_programs(2) - 1)
    def _():
        o_ref[...] = (acc_ref[...] + b_ref[...]).astype(o_ref.dtype)


# ------------------------------------------------------ prepare (cacheable)

class TopKastPrepared(NamedTuple):
    w_t_bf16: jax.Array   # (kp, np_) masked W^T, bf16, padded to the tile grid
    bias_f32: jax.Array   # (1, np_) f32, padded
    in_features: int
    out_features: int
    tk: int
    tn: int


def _choose_kn_tiles(in_features: int, out_features: int,
                     *, tk_max: int = 1024, tn_max: int = 1024):
    kp128 = _round_up(in_features, 128)
    np128 = _round_up(out_features, 128)
    tk = min(tk_max, kp128)
    tn = min(tn_max, np128)
    # v7x has 2 TensorCores/chip: if the parallel (i, j) sub-grid would be a
    # single step in j (small batch usually means a single i step too), split
    # the output dimension so both cores get work.  No-op for tiny layers.
    if np128 // tn < 2 and np128 >= 256:
        tn = _round_up(pl.cdiv(np128, 2), 128)
    kp = _round_up(in_features, tk)
    np_ = _round_up(out_features, tn)
    return tk, tn, kp, np_


def topkast_prepare(weight: jax.Array, bias: Optional[jax.Array],
                    p_forward: float) -> TopKastPrepared:
    """Build the cached forward operands.  Call once per weight update (i.e.
    whenever update_active_param_set() would run) and reuse across forward
    calls: the global quantile sort, mask, transpose, padding and bf16 cast
    all live here, off the per-call critical path."""
    out_features, in_features = weight.shape
    tk, tn, kp, np_ = _choose_kn_tiles(in_features, out_features)

    w32 = weight.astype(jnp.float32)
    # Exact PyTorch threshold semantics: quantile + compare on the original
    # f32 weights, BEFORE any bf16 cast.
    # TODO(synk): a global quantile has no clean in-kernel Pallas equivalent;
    # it stays as JAX glue here (amortized across forward calls by caching).
    threshold = jnp.quantile(jnp.abs(w32), p_forward)
    w_eff = jnp.where(jnp.abs(w32) >= threshold, w32, 0.0)

    # Pre-transposed (in_features, out_features), zero-padded, bf16.
    w_t = jnp.pad(w_eff.T, ((0, kp - in_features), (0, np_ - out_features)))
    w_t_bf16 = w_t.astype(jnp.bfloat16)

    if bias is None:
        bias = jnp.zeros((out_features,), jnp.float32)
    b_p = jnp.pad(bias.astype(jnp.float32).reshape(1, -1),
                  ((0, 0), (0, np_ - out_features)))

    return TopKastPrepared(w_t_bf16, b_p, in_features, out_features, tk, tn)


# --------------------------------------------------------------- hot path

def topkast_linear_apply(x: jax.Array, prepared: TopKastPrepared,
                         *, tm_max: int = 512, out_dtype=None) -> jax.Array:
    batch, in_features = x.shape
    assert in_features == prepared.in_features
    out_dtype = out_dtype or x.dtype
    out_itemsize = jnp.dtype(out_dtype).itemsize

    kp, np_ = prepared.w_t_bf16.shape
    tk, tn = prepared.tk, prepared.tn

    # Sublane-align to 16 (bf16 packing); cap so tiles stay modest.
    tm = min(tm_max, _round_up(batch, 16))
    mp = _round_up(batch, tm)

    # Activations streamed as bf16; padded zeros are inert and sliced off.
    x_p = jnp.pad(x.astype(jnp.bfloat16),
                  ((0, mp - batch), (0, kp - in_features)))

    gm, gn, gk = mp // tm, np_ // tn, kp // tk

    # HBM bytes including revisit factors: x re-read once per j block, weight
    # re-read once per i block, output written once (f32/out dtype).
    bytes_accessed = (2 * mp * kp * gn + 2 * kp * np_ * gm
                      + 4 * np_ * gm + out_itemsize * mp * np_)
    cost = pl.CostEstimate(flops=2 * mp * np_ * kp, transcendentals=0,
                           bytes_accessed=bytes_accessed)

    # Double-buffered in/out tiles + (optional) f32 accumulator scratch.
    need = (2 * (tm * tk * 2 + tk * tn * 2 + tn * 4)
            + 2 * tm * tn * out_itemsize
            + (tm * tn * 4 if gk > 1 else 0))
    # Explicit limit with headroom; capped at 48 MiB to stay inside v7x's
    # 64 MiB physical VMEM (v5e/v6e have 128 MiB, so this is safe everywhere).
    vmem_limit = int(min(48 * 1024 * 1024,
                         max(32 * 1024 * 1024, need + (8 << 20))))

    if gk == 1:
        kernel = _matmul_bias_kernel
        grid_spec = pltpu.PrefetchScalarGridSpec(
            num_scalar_prefetch=0,
            grid=(gm, gn),
            in_specs=[
                pl.BlockSpec((tm, tk), lambda i, j: (i, 0)),   # x (bf16)
                pl.BlockSpec((tk, tn), lambda i, j: (0, j)),   # masked W^T (bf16)
                pl.BlockSpec((1, tn), lambda i, j: (0, j)),    # bias (f32)
            ],
            out_specs=pl.BlockSpec((tm, tn), lambda i, j: (i, j)),
        )
        dims = ("parallel", "parallel")
    else:
        kernel = _matmul_bias_acc_kernel
        grid_spec = pltpu.PrefetchScalarGridSpec(
            num_scalar_prefetch=0,
            grid=(gm, gn, gk),
            in_specs=[
                pl.BlockSpec((tm, tk), lambda i, j, k: (i, k)),   # x (bf16)
                pl.BlockSpec((tk, tn), lambda i, j, k: (k, j)),   # W^T (bf16)
                pl.BlockSpec((1, tn), lambda i, j, k: (0, j)),    # bias (f32)
            ],
            out_specs=pl.BlockSpec((tm, tn), lambda i, j, k: (i, j)),
            scratch_shapes=[pltpu.VMEM((tm, tn), jnp.float32)],
        )
        dims = ("parallel", "parallel", "arbitrary")

    out_p = pl.pallas_call(
        kernel,
        out_shape=jax.ShapeDtypeStruct((mp, np_), out_dtype),
        grid_spec=grid_spec,
        compiler_params=pltpu.CompilerParams(
            dimension_semantics=dims, vmem_limit_bytes=vmem_limit),
        cost_estimate=cost,
    )(x_p, prepared.w_t_bf16, prepared.bias_f32)

    return out_p[:batch, :prepared.out_features]


def topkast_linear_forward(x, weight, bias, p_forward):
    """Uncached convenience path (prepare + apply).  In a training loop, call
    topkast_prepare() once per weight update and reuse the result instead."""
    return topkast_linear_apply(x, topkast_prepare(weight, bias, p_forward))


# ---------------------------------------------------------------- init/demo

def init_params(key, in_features, out_features, dtype=jnp.float32):
    """Deterministic init mirroring the PyTorch reset_parameters():
    kaiming_uniform_(a=sqrt(5)) -> U(-1/sqrt(fan_in), 1/sqrt(fan_in)),
    bias                        -> U(-1/sqrt(fan_in), 1/sqrt(fan_in))."""
    kw, kb = jax.random.split(key)
    fan_in = in_features
    bound = 1.0 / math.sqrt(fan_in) if fan_in > 0 else 0.0
    weight = jax.random.uniform(
        kw, (out_features, in_features), dtype, minval=-bound, maxval=bound)
    bias = jax.random.uniform(
        kb, (out_features,), dtype, minval=-bound, maxval=bound)
    return weight, bias


if __name__ == "__main__":
    in_features = 32
    out_features = 16
    batch = 8
    p_forward = 0.6
    p_backward = 0.4  # only affects the backward set; forward output unchanged
    # TODO(synk): backward-set bookkeeping (idx_bwd / idx_justbwd /
    # reset_justbwd_weights) is training-state management, not forward compute.

    key = jax.random.PRNGKey(0)
    k_param, k_x = jax.random.split(key)
    weight, bias = init_params(k_param, in_features, out_features)
    x = jax.random.normal(k_x, (batch, in_features), jnp.float32)

    # Prepare once (cacheable across forward calls), then run the kernel.
    prepared = topkast_prepare(weight, bias, p_forward)
    out = topkast_linear_apply(x, prepared)
    out = jax.block_until_ready(out)
    assert out.shape == (batch, out_features)

    # Pure-JAX references.
    thr = jnp.quantile(jnp.abs(weight), p_forward)
    w_eff = jnp.where(jnp.abs(weight) >= thr, weight, 0.0)
    # Reference matching the kernel's bf16-operand / f32-accumulate numerics.
    ref_bf16 = jnp.dot(x.astype(jnp.bfloat16),
                       w_eff.T.astype(jnp.bfloat16),
                       preferred_element_type=jnp.float32) + bias[None, :]
    # Full-precision reference (looser tolerance: bf16 matmul operands).
    ref_f32 = x @ w_eff.T + bias[None, :]

    assert jnp.allclose(out, ref_bf16, atol=1e-4, rtol=1e-4)
    assert jnp.allclose(out, ref_f32, atol=2e-2, rtol=2e-2)

    print("KERNEL_OK")
</pallas_src>

<mosaic_0001>
module attributes {stable_mosaic.version = 11 : i64} {
  func.func @_matmul_bias_kernel(%arg0: i32, %arg1: i32, %arg2: memref<16x128xbf16, #tpu.memory_space<vmem>>, %arg3: memref<128x128xbf16, #tpu.memory_space<vmem>>, %arg4: memref<1x128xf32, #tpu.memory_space<vmem>>, %arg5: memref<16x128xf32, #tpu.memory_space<vmem>>) attributes {dimension_semantics = [#tpu.dimension_semantics<parallel>, #tpu.dimension_semantics<parallel>], iteration_bounds = array<i64: 1, 1>, scalar_prefetch = 0 : i64, scratch_operands = 0 : i64, tpu.core_type = #tpu.core_type<tc>, window_params = [{transform_indices = @transform_0, window_bounds = array<i64: 16, 128>}, {transform_indices = @transform_1, window_bounds = array<i64: 128, 128>}, {transform_indices = @transform_2, window_bounds = array<i64: 1, 128>}, {transform_indices = @transform_3, window_bounds = array<i64: 16, 128>}]} {
    %c0 = arith.constant 0 : index
    %c0_0 = arith.constant 0 : index
    %0 = vector.load %arg2[%c0, %c0_0] : memref<16x128xbf16, #tpu.memory_space<vmem>>, vector<16x128xbf16>
    %c0_1 = arith.constant 0 : index
    %c0_2 = arith.constant 0 : index
    %1 = vector.load %arg3[%c0_1, %c0_2] : memref<128x128xbf16, #tpu.memory_space<vmem>>, vector<128x128xbf16>
    %cst = arith.constant dense<0.000000e+00> : vector<16x128xf32>
    %2 = tpu.matmul %0, %1, %cst {dimension_numbers = #tpu.dot_dimension_numbers<[1], [0], [0], [1], [0, 0, 1, 1], [], []>} : vector<16x128xbf16>, vector<128x128xbf16>, vector<16x128xf32> -> vector<16x128xf32>
    %c0_3 = arith.constant 0 : index
    %c0_4 = arith.constant 0 : index
    %3 = vector.load %arg4[%c0_3, %c0_4] : memref<1x128xf32, #tpu.memory_space<vmem>>, vector<1x128xf32>
    %4 = vector.broadcast %3 : vector<1x128xf32> to vector<16x128xf32>
    %5 = arith.addf %2, %4 : vector<16x128xf32>
    %c0_5 = arith.constant 0 : index
    %c0_6 = arith.constant 0 : index
    %6 = vector.load %arg5[%c0_5, %c0_6] : memref<16x128xf32, #tpu.memory_space<vmem>>, vector<16x128xf32>
    tpu.vector_store %arg5[%c0_5, %c0_6], %5 {strides = array<i32>} : memref<16x128xf32, #tpu.memory_space<vmem>>, vector<16x128xf32>,
    return
  }
  func.func @transform_0(%arg0: i32, %arg1: i32) -> (i32, i32) {
    %c0_i32 = arith.constant 0 : i32
    %c0_i32_0 = arith.constant 0 : i32
    return %arg0, %c0_i32 : i32, i32
  }
  func.func @transform_1(%arg0: i32, %arg1: i32) -> (i32, i32) {
    %c0_i32 = arith.constant 0 : i32
    %c0_i32_0 = arith.constant 0 : i32
    return %c0_i32, %arg1 : i32, i32
  }
  func.func @transform_2(%arg0: i32, %arg1: i32) -> (i32, i32) {
    %c0_i32 = arith.constant 0 : i32
    %c0_i32_0 = arith.constant 0 : i32
    return %c0_i32, %arg1 : i32, i32
  }
  func.func @transform_3(%arg0: i32, %arg1: i32) -> (i32, i32) {
    %c0_i32 = arith.constant 0 : i32
    return %arg0, %arg1 : i32, i32
  }
}

</mosaic_0001>

<bundles_post_ra>
// kernel: tpu_custom_call.1
= control target key start
LH: loop header
LB: loop body
LE: loop exit
PB: predicated region body
PF: predicated region fallthrough
CT: control target
= control target key end

     0   :  { %8 = vsyncpa [#allocation3], 0  ;;  %s381_s0 = inlined_call_operand.hbm [shape: bf16[16,128], index: 0, kind: input, shape index: {}]   ;;  %s382_s1 = inlined_call_operand.hbm [shape: bf16[128,128], index: 1, kind: input, shape index: {}]   ;;  %s383_s2 = inlined_call_operand.vmem [shape: f32[1,128], index: 2, kind: input, shape index: {}]   ;;  %s384_s3 = inlined_call_operand.hbm [shape: f32[16,128], index: 3, kind: output, shape index: {}]  }
   0x1   :  { %9 = vsyncpa [#allocation6], 0 }
   0x2   :  { %10 = vsyncpa [#allocation4], 0  ;;  %s313_s12 = smov [#allocation2]   ;;  %s241_s16 = scalar_lea.hbm %s381_s0, 128 }
   0x3   :  { %s16_s13 = sshll.u32 %s313_s12, 4  ;;  %p242_p0 = scmp.ne.s32.totalorder %s381_s0, %s241_s16  ;;  %s17_s13 = int_to_ptr.vmem [resolvable:$true] %s16_s13 }
   0x4   :  { %p245_p1 = scmp.lt.u32.totalorder %s241_s16, %s381_s0 }
   0x6   :  { %p247_p2 = pnand %p245_p1, %p242_p0 }
   0x8   :  { %250 = shalt.err (!%p247_p2)
}
   0x9   :  { %s251_s21 = scalar_lea.vmem %s17_s13, 128  ;;  %p256_p4 = scmp.lt.s32.totalorder %s17_s13, %s17_s13 }
   0xa   :  { %p252_p3 = scmp.ne.s32.totalorder %s17_s13, %s251_s21  ;;  %p257_p5 = scmp.lt.s32.totalorder %s251_s21, %s251_s21 }
   0xc   :  { %p258_p6 = por %p257_p5, %p256_p4 }
   0xe   :  { %p259_p7 = pnand %p258_p6, %p252_p3 }
  0x10   :  { %262 = shalt.err (!%p259_p7)
}
  0x11   :  { %s314_s22 = smov 64   ;;  %s315_s23 = smov 4  }
  0x12   :  { %22 = dma.hbm_to_vmem [thread:$0]  %s381_s0, 128, %s17_s13, [#allocation3], %s314_s22, %s314_s22, %s315_s23  }
  0x13   :  { %s316_s26 = smov [#allocation5]   ;;  %s263_s30 = scalar_lea.hbm %s382_s1, 1024 }
  0x14   :  { %s28_s27 = sshll.u32 %s316_s26, 4  ;;  %p264_p8 = scmp.ne.s32.totalorder %s382_s1, %s263_s30  ;;  %s29_s27 = int_to_ptr.vmem [resolvable:$true] %s28_s27 }
  0x15   :  { %p267_p9 = scmp.lt.u32.totalorder %s263_s30, %s382_s1 }
  0x17   :  { %p269_p10 = pnand %p267_p9, %p264_p8 }
  0x19   :  { %272 = shalt.err (!%p269_p10)
}
  0x1a   :  { %s273_s8 = scalar_lea.vmem %s29_s27, 1024  ;;  %p278_p12 = scmp.lt.s32.totalorder %s29_s27, %s29_s27 }
  0x1b   :  { %p274_p11 = scmp.ne.s32.totalorder %s29_s27, %s273_s8  ;;  %p279_p13 = scmp.lt.s32.totalorder %s273_s8, %s273_s8 }
  0x1d   :  { %p280_p0 = por %p279_p13, %p278_p12 }
  0x1f   :  { %p281_p1 = pnand %p280_p0, %p274_p11 }
  0x21   :  { %284 = shalt.err (!%p281_p1)
}
  0x22   :  { %34 = dma.hbm_to_vmem [thread:$0]  %s382_s1, 1024, %s29_s27, [#allocation6], %s314_s22, %s314_s22, %s315_s23  }
  0x23   :  { %307 = dma.done.wait [#allocation3], 128  }
  0x24   :  { %308 = vsyncadd [#allocation3], 4294967168 }
  0x25   :  { %309 = dma.done.wait [#allocation6], 1024  }
  0x26   :  { %310 = vsyncadd [#allocation6], 4294966272  ;;  %v317_v0 = vmov 0.0   ;;  %vm318_vm0 = vmmov 0   ;;  %v232_v1 = vld [vmem:[#allocation5] sm:$0xff]   ;;  %v233_v2 = vld [vmem:[#allocation5 + $0x8] sm:$0xff]  }
  0x27   :  { %203 = vmatprep.subr.bf16.mxu0 %v317_v0  ;;  %219 = vmatprep.mubr.msk.bf16.mxu0 %vm318_vm0, %v317_v0  ;;  %v234_v3 = vld [vmem:[#allocation5 + $0x10] sm:$0xff]   ;;  %v235_v4 = vld [vmem:[#allocation5 + $0x18] sm:$0xff]   ;;  %v236_v5 = vld [vmem:[#allocation5 + $0x20] sm:$0xff]   ;;  %s319_s11 = smov [#allocation7]  }
  0x28   :  { %204 = vmatpush3.bf16.msra.mxu0 %v232_v1  ;;  %v237_v6 = vld [vmem:[#allocation5 + $0x28] sm:$0xff]   ;;  %v238_v7 = vld [vmem:[#allocation5 + $0x30] sm:$0xff]   ;;  %v239_v8 = vld [vmem:[#allocation5 + $0x38] sm:$0xff]   ;;  %s171_s12 = sshll.u32 %s319_s11, 4  ;;  %s172_s12 = int_to_ptr.vmem [resolvable:$true] %s171_s12 }
  0x29   :  { %205 = vmatprep.subr.bf16.mxu0 %v317_v0  ;;  %v240_v9 = vld [vmem:[#allocation2] sm:$0xff]   ;;  %s285_s13 = scalar_lea.vmem %s172_s12, 256  ;;  %p290_p3 = scmp.lt.s32.totalorder %s172_s12, %s172_s12 }
  0x2a   :  { %v184_v10 = vld [vmem:[%s383_s2] ss:$0 sm:$0xff]  ;;  %p286_p2 = scmp.ne.s32.totalorder %s172_s12, %s285_s13  ;;  %p291_p4 = scmp.lt.s32.totalorder %s285_s13, %s285_s13 }
  0x2c   :  { %206 = vmatpush3.bf16.msra.mxu0 %v233_v2  ;;  %p292_p5 = por %p291_p4, %p290_p3 }
  0x2d   :  { %207 = vmatprep.subr.bf16.mxu0 %v317_v0 }
  0x2e   :  { %p293_p6 = pnand %p292_p5, %p286_p2 }
  0x30   :  { %208 = vmatpush3.bf16.msra.mxu0 %v234_v3 }
  0x31   :  { %209 = vmatprep.subr.bf16.mxu0 %v317_v0 }
  0x34   :  { %210 = vmatpush3.bf16.msra.mxu0 %v235_v4 }
  0x35   :  { %211 = vmatprep.subr.bf16.mxu0 %v317_v0 }
  0x38   :  { %212 = vmatpush3.bf16.msra.mxu0 %v236_v5 }
  0x39   :  { %213 = vmatprep.subr.bf16.mxu0 %v317_v0 }
  0x3c   :  { %214 = vmatpush3.bf16.msra.mxu0 %v237_v6 }
  0x3d   :  { %215 = vmatprep.subr.bf16.mxu0 %v317_v0 }
  0x40   :  { %216 = vmatpush3.bf16.msra.mxu0 %v238_v7 }
  0x41   :  { %217 = vmatprep.subr.bf16.mxu0 %v317_v0 }
  0x44   :  { %218 = vmatpush3.bf16.msra.mxu0 %v239_v8 }
  0x47   :  { %220 = vmatmul.mubr.bf16.vlgmr.msra.gmra.mrb[0].mxu0 %v240_v9 }
 0x11a   :  { %v157_v11 = vpop.f32.mrb[0].mxu0 }
 0x11b   :  { %v158_v12 = vadd.f32 %v184_v10, %v157_v11  ;;  %v221_v13 = vpop.f32.mrb[1].mxu0 }
 0x11c   :  { %v160_v14 = vpop.f32.mrb[2].mxu0 }
 0x11d   :  { %164 = vst [vmem:[#allocation7] sm:$0xff] %v158_v12  ;;  %v161_v15 = vadd.f32 %v184_v10, %v160_v14  ;;  %v222_v16 = vpop.f32.mrb[3].mxu0 }
 0x11f   :  { %165 = vst [vmem:[#allocation7 + $0x8] sm:$0xff] %v161_v15 }
 0x120   :  { %296 = shalt.err (!%p293_p6)
}
 0x121   :  { %s297_s15 = scalar_lea.hbm %s384_s3, 256 }
 0x122   :  { %p298_p7 = scmp.ne.s32.totalorder %s384_s3, %s297_s15  ;;  %p301_p8 = scmp.lt.u32.totalorder %s297_s15, %s384_s3 }
 0x124   :  { %p303_p9 = pnand %p301_p8, %p298_p7 }
 0x126   :  { %306 = shalt.err (!%p303_p9)
}
 0x127   :  { %s320_s20 = smov 128   ;;  %s321_s21 = smov 8  }
 0x128   :  { %177 = dma.vmem_to_hbm [thread:$0]  %s172_s12, 256, %s384_s3, [#allocation4], %s320_s20, %s320_s20, %s321_s21  }
 0x129   :  { %311 = dma.done.wait [#allocation4], 256  }
 0x12a   :  { %312 = vsyncadd [#allocation4], 4294967040 }
 0x12b   :  { %181 = vsyncpa [#allocation3], 1 }
 0x12c   :  { %182 = vsyncpa [#allocation6], 1 }
 0x12d   :  { %183 = vsyncpa [#allocation4], 1 }

</bundles_post_ra>
